<compile_context>
chip_gen: v7x
topology: tpu7x:2x2x1
jax: 0.10.0
libtpu: 0.0.40
codegen_flags: <defaults>
</compile_context>

<pallas_src>
import jax
import jax.numpy as jnp
from jax.experimental import pallas as pl
from jax.experimental.pallas import tpu as pltpu


def _round_up(x, m):
    return ((x + m - 1) // m) * m


def _full_spec(arr):
    nd = arr.ndim
    return pl.BlockSpec(arr.shape, lambda *_, _nd=nd: (0,) * _nd)


# ----------------------------------------------------------------------------
# Encoder kernel: conv1 -> conv2 -> conv5 (all per-point, channel-major) plus
# global max pool.  Grid: (B, N_tiles); the N-tile axis is a reduction
# ("arbitrary") with a running-max accumulator initialized to 0 (valid: h5 is
# post-ReLU >= 0).
# ----------------------------------------------------------------------------
def _make_encoder_kernel(n_points, tile_n, n_pad):
    needs_mask = (n_pad != n_points)

    def kernel(x_ref, w1_ref, t1_ref, w2_ref, t2_ref, w5_ref, t5_ref,
               emb_ref, mx_ref):
        nt = pl.program_id(1)

        @pl.when(nt == 0)
        def _init():
            mx_ref[...] = jnp.zeros_like(mx_ref)

        x = x_ref[0]                                 # (3, tile_n) f32
        w1 = w1_ref[...]                             # (64, 3) f32, BN-scaled

        # conv1, kernel (3,1): K=3 contraction done on the VPU as three
        # broadcast FMAs (keeps the MXU for conv2/conv5).  BN scale already
        # folded into w1; only the shift remains.
        h = (w1[:, 0:1] * x[0:1, :]
             + w1[:, 1:2] * x[1:2, :]
             + w1[:, 2:3] * x[2:3, :])
        h = jnp.maximum(h + t1_ref[...], 0.0)        # (64, tile_n)

        # conv2 (1x1): 64 -> 64, BN(eval, folded) + ReLU.
        h = jnp.dot(w2_ref[...], h.astype(jnp.bfloat16),
                    preferred_element_type=jnp.float32)
        h = jnp.maximum(h + t2_ref[...], 0.0)        # (64, tile_n)

        # conv5 (1x1): 64 -> latent, BN(eval, folded) + ReLU.
        h5 = jnp.dot(w5_ref[...], h.astype(jnp.bfloat16),
                     preferred_element_type=jnp.float32)
        h5 = jnp.maximum(h5 + t5_ref[...], 0.0)      # (L, tile_n)

        if needs_mask:
            # Padded points must not contribute to the max; masking to 0 is
            # safe because real h5 values are post-ReLU (>= 0).
            col = nt * tile_n + jax.lax.broadcasted_iota(
                jnp.int32, (1, tile_n), 1)
            h5 = jnp.where(col < n_points, h5, 0.0)

        mx_ref[...] = jnp.maximum(mx_ref[...],
                                  jnp.max(h5, axis=1, keepdims=True))

        @pl.when(nt == pl.num_programs(1) - 1)
        def _finalize():
            emb_ref[0] = mx_ref[...]

    return kernel


# ----------------------------------------------------------------------------
# Decoder kernel: only the big fc3 matmul, tiled lane-dense over the output
# columns; fc1/fc2 are computed once outside (hoisted out of the tile loop).
# ----------------------------------------------------------------------------
def _dec_kernel(f_ref, wf3_ref, bf3_ref, out_ref):
    out_ref[...] = (jnp.dot(f_ref[...], wf3_ref[...],
                            preferred_element_type=jnp.float32)
                    + bf3_ref[...])


# ----------------------------------------------------------------------------
# Wrapper
# ----------------------------------------------------------------------------
def autoencoder_point2_forward(point_cloud, params, *, tile_n=None,
                               tile_out=2048):
    """point_cloud: (B, 3, N) f32 -> (net (B,3,N), {'embedding': (B,L)})."""
    B, point_dim, N = point_cloud.shape
    L = params["w5s"].shape[0]
    out_dim = params["wf3t"].shape[1]                 # 3 * N
    f32, bf16 = jnp.float32, jnp.bfloat16

    # ---------------- encoder ----------------
    if tile_n is None:
        tile_n = N if N <= 4096 else 2048             # big tiles amortize step overhead
    if tile_n >= N:
        tile_n = N                                    # single full tile: no pad, no mask
    else:
        tile_n = max(128, (int(tile_n) // 128) * 128)  # lane-aligned tiles
    n_pad = _round_up(N, tile_n)
    n_tiles = n_pad // tile_n

    x = point_cloud.astype(f32)
    if n_pad != N:
        x = jnp.pad(x, ((0, 0), (0, 0), (0, n_pad - N)))

    enc_args = [params["w1s"].astype(f32), params["t1"].astype(f32),
                params["w2s"].astype(bf16), params["t2"].astype(f32),
                params["w5s"].astype(bf16), params["t5"].astype(f32)]

    emb3 = pl.pallas_call(
        _make_encoder_kernel(N, tile_n, n_pad),
        grid=(B, n_tiles),
        in_specs=[pl.BlockSpec((1, point_dim, tile_n),
                               lambda b, nt: (b, 0, nt))]
                 + [_full_spec(a) for a in enc_args],
        out_specs=pl.BlockSpec((1, L, 1), lambda b, nt: (b, 0, 0)),
        out_shape=jax.ShapeDtypeStruct((B, L, 1), f32),
        scratch_shapes=[pltpu.VMEM((L, 1), f32)],
        compiler_params=pltpu.CompilerParams(
            dimension_semantics=("parallel", "arbitrary"),
            vmem_limit_bytes=32 * 1024 * 1024),
    )(x, *enc_args)

    emb = emb3.reshape(B, L)                          # f32 embedding

    # ---------------- fc1 / fc2 (tiny; run ONCE in plain XLA) ----------------
    f = jnp.dot(emb.astype(bf16), params["wf1t"].astype(bf16),
                preferred_element_type=f32) + params["bf1"]
    f = jnp.maximum(f, 0.0)
    f = jnp.dot(f.astype(bf16), params["wf2t"].astype(bf16),
                preferred_element_type=f32) + params["bf2"]
    f = jnp.maximum(f, 0.0).astype(bf16)              # (B, L) bf16

    # ---------------- decoder: streamed fc3 ----------------
    tile_out = min(int(tile_out), _round_up(out_dim, 128))
    tile_out = max(128, (tile_out // 128) * 128)
    out_pad = _round_up(out_dim, tile_out)            # pad up; no divisor search
    n_out_tiles = out_pad // tile_out

    wf3t = params["wf3t"].astype(bf16)
    bf3 = params["bf3"].astype(f32)
    if out_pad != out_dim:
        wf3t = jnp.pad(wf3t, ((0, 0), (0, out_pad - out_dim)))
        bf3 = jnp.pad(bf3, ((0, 0), (0, out_pad - out_dim)))

    net_pad = pl.pallas_call(
        _dec_kernel,
        grid=(n_out_tiles,),
        in_specs=[_full_spec(f),
                  pl.BlockSpec((L, tile_out), lambda j: (0, j)),
                  pl.BlockSpec((1, tile_out), lambda j: (0, j))],
        out_specs=pl.BlockSpec((B, tile_out), lambda j: (0, j)),
        out_shape=jax.ShapeDtypeStruct((B, out_pad), f32),
        compiler_params=pltpu.CompilerParams(
            dimension_semantics=("parallel",),
            vmem_limit_bytes=32 * 1024 * 1024),
    )(f, wf3t, bf3)

    net = net_pad[:, :out_dim].reshape(B, 3, N)       # matches net.view(B, 3, N)
    return net, {"embedding": emb}


# ----------------------------------------------------------------------------
# Deterministic synthetic parameters with the shapes implied by __init__.
# BN (eval mode) is folded into the conv weights/bias (channel-major).
# ----------------------------------------------------------------------------
def init_params(key, num_points, latent_size):
    point_dim = 3
    eps = 1e-5
    keys = jax.random.split(key, 40)
    it = iter(keys)

    def nrm(shape, scale=0.1):
        return scale * jax.random.normal(next(it), shape, dtype=jnp.float32)

    w1 = nrm((64, point_dim));       b1 = nrm((64,))
    w2 = nrm((64, 64));              b2 = nrm((64,))
    w5 = nrm((latent_size, 64));     b5 = nrm((latent_size,))

    def bn(c):
        gamma = 1.0 + nrm((c,))
        beta = nrm((c,))
        mean = nrm((c,))
        var = jax.random.uniform(next(it), (c,), minval=0.5, maxval=1.5,
                                 dtype=jnp.float32)
        return gamma, beta, mean, var

    g1, be1, m1, v1 = bn(64)
    g2, be2, m2, v2 = bn(64)
    g5, be5, m5, v5 = bn(latent_size)

    def fold(w, b, gamma, beta, mean, var):
        # eval-mode BN folded into the conv weight + bias:
        #   y = scale*(Wx + b - mean) + beta = (scale*W)x + (beta + scale*(b-mean))
        scale = gamma / jnp.sqrt(var + eps)
        return w * scale[:, None], (beta + scale * (b - mean))[:, None]

    w1s, t1 = fold(w1, b1, g1, be1, m1, v1)
    w2s, t2 = fold(w2, b2, g2, be2, m2, v2)
    w5s, t5 = fold(w5, b5, g5, be5, m5, v5)

    wf1 = nrm((latent_size, latent_size));    bf1 = nrm((latent_size,))
    wf2 = nrm((latent_size, latent_size));    bf2 = nrm((latent_size,))
    wf3 = nrm((num_points * 3, latent_size)); bf3 = nrm((num_points * 3,))

    return dict(w1s=w1s, t1=t1, w2s=w2s, t2=t2, w5s=w5s, t5=t5,
                wf1t=wf1.T, bf1=bf1[None, :],
                wf2t=wf2.T, bf2=bf2[None, :],
                wf3t=wf3.T, bf3=bf3[None, :])


# ----------------------------------------------------------------------------
# Pure-JAX reference mirroring the kernel's precision (bf16 weights/acts with
# f32 accumulation), for validation.
# ----------------------------------------------------------------------------
def reference_forward(x, params):
    bf16, f32 = jnp.bfloat16, jnp.float32
    B, _, N = x.shape
    h = jnp.einsum("oc,bcn->bon", params["w1s"], x.astype(f32)) \
        + params["t1"][None]
    h = jnp.maximum(h, 0.0)
    h = jnp.einsum("oc,bcn->bon", params["w2s"].astype(bf16), h.astype(bf16),
                   preferred_element_type=f32) + params["t2"][None]
    h = jnp.maximum(h, 0.0)
    h5 = jnp.einsum("oc,bcn->bon", params["w5s"].astype(bf16), h.astype(bf16),
                    preferred_element_type=f32) + params["t5"][None]
    h5 = jnp.maximum(h5, 0.0)
    emb = jnp.max(h5, axis=2)                                     # (B, L)
    f = jnp.dot(emb.astype(bf16), params["wf1t"].astype(bf16),
                preferred_element_type=f32) + params["bf1"]
    f = jnp.maximum(f, 0.0)
    f = jnp.dot(f.astype(bf16), params["wf2t"].astype(bf16),
                preferred_element_type=f32) + params["bf2"]
    f = jnp.maximum(f, 0.0)
    out = jnp.dot(f.astype(bf16), params["wf3t"].astype(bf16),
                  preferred_element_type=f32) + params["bf3"]
    return out.reshape(B, 3, N), emb


if __name__ == "__main__":
    B = 2
    num_points = 200       # small stand-in for the default 2500
    latent_size = 128      # small stand-in for the default 512

    key = jax.random.PRNGKey(0)
    kp, kx = jax.random.split(key)
    params = init_params(kp, num_points, latent_size)
    x = jax.random.normal(kx, (B, 3, num_points), dtype=jnp.float32)

    ref_net, ref_emb = reference_forward(x, params)

    # Default path: whole cloud in a single encoder tile, large decoder tiles.
    net, end_points = autoencoder_point2_forward(x, params)
    net = jax.block_until_ready(net)
    emb = jax.block_until_ready(end_points["embedding"])
    assert net.shape == (B, 3, num_points)
    assert emb.shape == (B, latent_size)
    assert bool(jnp.all(jnp.isfinite(net))) and bool(jnp.all(jnp.isfinite(emb)))
    assert bool(jnp.allclose(emb, ref_emb, rtol=1e-2, atol=1e-2))
    assert bool(jnp.allclose(net, ref_net, rtol=1e-2, atol=1e-2))

    # Forced-tiling path: tile_n=128 -> N padded to 256 (running max + mask),
    # tile_out=256 -> padded output columns exercised as well.
    net2, ep2 = autoencoder_point2_forward(x, params, tile_n=128, tile_out=256)
    net2 = jax.block_until_ready(net2)
    emb2 = jax.block_until_ready(ep2["embedding"])
    assert bool(jnp.allclose(emb2, ref_emb, rtol=1e-2, atol=1e-2))
    assert bool(jnp.allclose(net2, ref_net, rtol=1e-2, atol=1e-2))

    print("KERNEL_OK")
</pallas_src>

<mosaic_0001>
module attributes {stable_mosaic.version = 11 : i64} {
  func.func @kernel(%arg0: i32, %arg1: i32, %arg2: memref<1x3x200xf32, #tpu.memory_space<vmem>>, %arg3: memref<64x3xf32, #tpu.memory_space<vmem>>, %arg4: memref<64x1xf32, #tpu.memory_space<vmem>>, %arg5: memref<64x64xbf16, #tpu.memory_space<vmem>>, %arg6: memref<64x1xf32, #tpu.memory_space<vmem>>, %arg7: memref<128x64xbf16, #tpu.memory_space<vmem>>, %arg8: memref<128x1xf32, #tpu.memory_space<vmem>>, %arg9: memref<1x128x1xf32, #tpu.memory_space<vmem>>, %arg10: memref<128x1xf32, #tpu.memory_space<vmem>>) attributes {dimension_semantics = [#tpu.dimension_semantics<parallel>, #tpu.dimension_semantics<arbitrary>], iteration_bounds = array<i64: 2, 1>, scalar_prefetch = 0 : i64, scratch_operands = 1 : i64, tpu.core_type = #tpu.core_type<tc>, window_params = [{transform_indices = @transform_0, window_bounds = array<i64: 1, 3, 200>}, {pipeline_mode = #tpu.pipeline_mode<synchronous>, transform_indices = @transform_1, window_bounds = array<i64: 64, 3>}, {pipeline_mode = #tpu.pipeline_mode<synchronous>, transform_indices = @transform_2, window_bounds = array<i64: 64, 1>}, {pipeline_mode = #tpu.pipeline_mode<synchronous>, transform_indices = @transform_3, window_bounds = array<i64: 64, 64>}, {pipeline_mode = #tpu.pipeline_mode<synchronous>, transform_indices = @transform_4, window_bounds = array<i64: 64, 1>}, {pipeline_mode = #tpu.pipeline_mode<synchronous>, transform_indices = @transform_5, window_bounds = array<i64: 128, 64>}, {pipeline_mode = #tpu.pipeline_mode<synchronous>, transform_indices = @transform_6, window_bounds = array<i64: 128, 1>}, {transform_indices = @transform_7, window_bounds = array<i64: 1, 128, 1>}]} {
    %c0_i32 = arith.constant 0 : i32
    %0 = arith.cmpi eq, %arg1, %c0_i32 : i32
    %1 = arith.extui %0 : i1 to i32
    %c0_i32_0 = arith.constant 0 : i32
    %2 = arith.cmpi ne, %1, %c0_i32_0 : i32
    scf.if %2 {
      %cst_26 = arith.constant 0.000000e+00 : f32
      %52 = vector.broadcast %cst_26 : f32 to vector<128x1xf32>
      %c0_27 = arith.constant 0 : index
      %c0_28 = arith.constant 0 : index
      %53 = vector.load %arg10[%c0_27, %c0_28] : memref<128x1xf32, #tpu.memory_space<vmem>>, vector<128x1xf32>
      tpu.vector_store %arg10[%c0_27, %c0_28], %52 {strides = array<i32>} : memref<128x1xf32, #tpu.memory_space<vmem>>, vector<128x1xf32>,
    } else {
    }
    %c0 = arith.constant 0 : index
    %c0_1 = arith.constant 0 : index
    %c0_2 = arith.constant 0 : index
    %3 = vector.load %arg2[%c0, %c0_1, %c0_2] : memref<1x3x200xf32, #tpu.memory_space<vmem>>, vector<1x3x200xf32>
    %4 = vector.shape_cast %3 : vector<1x3x200xf32> to vector<3x200xf32>
    %c0_3 = arith.constant 0 : index
    %c0_4 = arith.constant 0 : index
    %5 = vector.load %arg3[%c0_3, %c0_4] : memref<64x3xf32, #tpu.memory_space<vmem>>, vector<64x3xf32>
    %6 = vector.extract_strided_slice %5 {offsets = [0, 0], sizes = [64, 1], strides = [1, 1]} : vector<64x3xf32> to vector<64x1xf32>
    %7 = vector.extract_strided_slice %4 {offsets = [0, 0], sizes = [1, 200], strides = [1, 1]} : vector<3x200xf32> to vector<1x200xf32>
    %8 = vector.broadcast %6 : vector<64x1xf32> to vector<64x200xf32>
    %9 = vector.broadcast %7 : vector<1x200xf32> to vector<64x200xf32>
    %10 = arith.mulf %8, %9 : vector<64x200xf32>
    %11 = vector.extract_strided_slice %5 {offsets = [0, 1], sizes = [64, 1], strides = [1, 1]} : vector<64x3xf32> to vector<64x1xf32>
    %12 = vector.extract_strided_slice %4 {offsets = [1, 0], sizes = [1, 200], strides = [1, 1]} : vector<3x200xf32> to vector<1x200xf32>
    %13 = vector.broadcast %11 : vector<64x1xf32> to vector<64x200xf32>
    %14 = vector.broadcast %12 : vector<1x200xf32> to vector<64x200xf32>
    %15 = arith.mulf %13, %14 : vector<64x200xf32>
    %16 = arith.addf %10, %15 : vector<64x200xf32>
    %17 = vector.extract_strided_slice %5 {offsets = [0, 2], sizes = [64, 1], strides = [1, 1]} : vector<64x3xf32> to vector<64x1xf32>
    %18 = vector.extract_strided_slice %4 {offsets = [2, 0], sizes = [1, 200], strides = [1, 1]} : vector<3x200xf32> to vector<1x200xf32>
    %19 = vector.broadcast %17 : vector<64x1xf32> to vector<64x200xf32>
    %20 = vector.broadcast %18 : vector<1x200xf32> to vector<64x200xf32>
    %21 = arith.mulf %19, %20 : vector<64x200xf32>
    %22 = arith.addf %16, %21 : vector<64x200xf32>
    %c0_5 = arith.constant 0 : index
    %c0_6 = arith.constant 0 : index
    %23 = vector.load %arg4[%c0_5, %c0_6] : memref<64x1xf32, #tpu.memory_space<vmem>>, vector<64x1xf32>
    %24 = vector.broadcast %23 : vector<64x1xf32> to vector<64x200xf32>
    %25 = arith.addf %22, %24 : vector<64x200xf32>
    %cst = arith.constant 0.000000e+00 : f32
    %26 = vector.broadcast %cst : f32 to vector<64x200xf32>
    %27 = arith.maximumf %25, %26 : vector<64x200xf32>
    %c0_7 = arith.constant 0 : index
    %c0_8 = arith.constant 0 : index
    %28 = vector.load %arg5[%c0_7, %c0_8] : memref<64x64xbf16, #tpu.memory_space<vmem>>, vector<64x64xbf16>
    %29 = arith.truncf %27 : vector<64x200xf32> to vector<64x200xbf16>
    %cst_9 = arith.constant dense<0.000000e+00> : vector<64x200xf32>
    %30 = tpu.matmul %28, %29, %cst_9 {dimension_numbers = #tpu.dot_dimension_numbers<[1], [0], [0], [1], [0, 0, 1, 1], [], []>} : vector<64x64xbf16>, vector<64x200xbf16>, vector<64x200xf32> -> vector<64x200xf32>
    %c0_10 = arith.constant 0 : index
    %c0_11 = arith.constant 0 : index
    %31 = vector.load %arg6[%c0_10, %c0_11] : memref<64x1xf32, #tpu.memory_space<vmem>>, vector<64x1xf32>
    %32 = vector.broadcast %31 : vector<64x1xf32> to vector<64x200xf32>
    %33 = arith.addf %30, %32 : vector<64x200xf32>
    %cst_12 = arith.constant 0.000000e+00 : f32
    %34 = vector.broadcast %cst_12 : f32 to vector<64x200xf32>
    %35 = arith.maximumf %33, %34 : vector<64x200xf32>
    %c0_13 = arith.constant 0 : index
    %c0_14 = arith.constant 0 : index
    %36 = vector.load %arg7[%c0_13, %c0_14] : memref<128x64xbf16, #tpu.memory_space<vmem>>, vector<128x64xbf16>
    %37 = arith.truncf %35 : vector<64x200xf32> to vector<64x200xbf16>
    %cst_15 = arith.constant dense<0.000000e+00> : vector<128x200xf32>
    %38 = tpu.matmul %36, %37, %cst_15 {dimension_numbers = #tpu.dot_dimension_numbers<[1], [0], [0], [1], [0, 0, 1, 1], [], []>} : vector<128x64xbf16>, vector<64x200xbf16>, vector<128x200xf32> -> vector<128x200xf32>
    %c0_16 = arith.constant 0 : index
    %c0_17 = arith.constant 0 : index
    %39 = vector.load %arg8[%c0_16, %c0_17] : memref<128x1xf32, #tpu.memory_space<vmem>>, vector<128x1xf32>
    %40 = vector.broadcast %39 : vector<128x1xf32> to vector<128x200xf32>
    %41 = arith.addf %38, %40 : vector<128x200xf32>
    %cst_18 = arith.constant 0.000000e+00 : f32
    %42 = vector.broadcast %cst_18 : f32 to vector<128x200xf32>
    %43 = arith.maximumf %41, %42 : vector<128x200xf32>
    %c0_19 = arith.constant 0 : index
    %c0_20 = arith.constant 0 : index
    %44 = vector.load %arg10[%c0_19, %c0_20] : memref<128x1xf32, #tpu.memory_space<vmem>>, vector<128x1xf32>
    %cst_21 = arith.constant dense<0xFF800000> : vector<128xf32>
    %45 = vector.multi_reduction <maximumf>, %43, %cst_21 [1] : vector<128x200xf32> to vector<128xf32>
    %46 = vector.shape_cast %45 : vector<128xf32> to vector<128x1xf32>
    %47 = arith.maximumf %44, %46 : vector<128x1xf32>
    %c0_22 = arith.constant 0 : index
    %c0_23 = arith.constant 0 : index
    %48 = vector.load %arg10[%c0_22, %c0_23] : memref<128x1xf32, #tpu.memory_space<vmem>>, vector<128x1xf32>
    tpu.vector_store %arg10[%c0_22, %c0_23], %47 {strides = array<i32>} : memref<128x1xf32, #tpu.memory_space<vmem>>, vector<128x1xf32>,
    %c0_i32_24 = arith.constant 0 : i32
    %49 = arith.cmpi eq, %arg1, %c0_i32_24 : i32
    %50 = arith.extui %49 : i1 to i32
    %c0_i32_25 = arith.constant 0 : i32
    %51 = arith.cmpi ne, %50, %c0_i32_25 : i32
    scf.if %51 {
      %c0_26 = arith.constant 0 : index
      %c0_27 = arith.constant 0 : index
      %52 = vector.load %arg10[%c0_26, %c0_27] : memref<128x1xf32, #tpu.memory_space<vmem>>, vector<128x1xf32>
      %c0_28 = arith.constant 0 : index
      %c0_29 = arith.constant 0 : index
      %c0_30 = arith.constant 0 : index
      %53 = vector.load %arg9[%c0_28, %c0_29, %c0_30] : memref<1x128x1xf32, #tpu.memory_space<vmem>>, vector<1x128x1xf32>
      %54 = vector.shape_cast %53 : vector<1x128x1xf32> to vector<128x1xf32>
      %55 = vector.shape_cast %52 : vector<128x1xf32> to vector<1x128x1xf32>
      tpu.vector_store %arg9[%c0_28, %c0_29, %c0_30], %55 {strides = array<i32>} : memref<1x128x1xf32, #tpu.memory_space<vmem>>, vector<1x128x1xf32>,
    } else {
    }
    return
  }
  func.func @transform_0(%arg0: i32, %arg1: i32) -> (i32, i32, i32) {
    %c0_i32 = arith.constant 0 : i32
    %c0_i32_0 = arith.constant 0 : i32
    return %arg0, %c0_i32, %arg1 : i32, i32, i32
  }
  func.func @transform_1(%arg0: i32, %arg1: i32) -> (i32, i32) {
    %c0_i32 = arith.constant 0 : i32
    %c0_i32_0 = arith.constant 0 : i32
    %c0_i32_1 = arith.constant 0 : i32
    return %c0_i32, %c0_i32_0 : i32, i32
  }
  func.func @transform_2(%arg0: i32, %arg1: i32) -> (i32, i32) {
    %c0_i32 = arith.constant 0 : i32
    %c0_i32_0 = arith.constant 0 : i32
    %c0_i32_1 = arith.constant 0 : i32
    return %c0_i32, %c0_i32_0 : i32, i32
  }
  func.func @transform_3(%arg0: i32, %arg1: i32) -> (i32, i32) {
    %c0_i32 = arith.constant 0 : i32
    %c0_i32_0 = arith.constant 0 : i32
    %c0_i32_1 = arith.constant 0 : i32
    return %c0_i32, %c0_i32_0 : i32, i32
  }
  func.func @transform_4(%arg0: i32, %arg1: i32) -> (i32, i32) {
    %c0_i32 = arith.constant 0 : i32
    %c0_i32_0 = arith.constant 0 : i32
    %c0_i32_1 = arith.constant 0 : i32
    return %c0_i32, %c0_i32_0 : i32, i32
  }
  func.func @transform_5(%arg0: i32, %arg1: i32) -> (i32, i32) {
    %c0_i32 = arith.constant 0 : i32
    %c0_i32_0 = arith.constant 0 : i32
    %c0_i32_1 = arith.constant 0 : i32
    return %c0_i32, %c0_i32_0 : i32, i32
  }
  func.func @transform_6(%arg0: i32, %arg1: i32) -> (i32, i32) {
    %c0_i32 = arith.constant 0 : i32
    %c0_i32_0 = arith.constant 0 : i32
    %c0_i32_1 = arith.constant 0 : i32
    return %c0_i32, %c0_i32_0 : i32, i32
  }
  func.func @transform_7(%arg0: i32, %arg1: i32) -> (i32, i32, i32) {
    %c0_i32 = arith.constant 0 : i32
    %c0_i32_0 = arith.constant 0 : i32
    %c0_i32_1 = arith.constant 0 : i32
    return %arg0, %c0_i32, %c0_i32_0 : i32, i32, i32
  }
}

</mosaic_0001>

<bundles_post_ra>
// kernel: tpu_custom_call.1
= control target key start
LH: loop header
LB: loop body
LE: loop exit
PB: predicated region body
PF: predicated region fallthrough
CT: control target
= control target key end

     0   :  { %s1558_s24 = smov 0   ;;  %s1560_s25 = smov 0   ;;  %s1956_s0 = inlined_call_operand.vmem [shape: f32[2,3,200], index: 0, kind: input, shape index: {}]   ;;  %s1957_s1 = inlined_call_operand.vmem [shape: f32[64,3], index: 1, kind: input, shape index: {}]   ;;  %s1958_s2 = inlined_call_operand.vmem [shape: f32[64,1], index: 2, kind: input, shape index: {}]   ;;  %s1959_s3 = inlined_call_operand.vmem [shape: bf16[64,64], index: 3, kind: input, shape index: {}]   ;;  %s1960_s4 = inlined_call_operand.vmem [shape: f32[64,1], index: 4, kind: input, shape index: {}]   ;;  %s1961_s5 = inlined_call_operand.vmem [shape: bf16[128,64], index: 5, kind: input, shape index: {}]   ;;  %s1962_s6 = inlined_call_operand.vmem [shape: f32[128,1], index: 6, kind: input, shape index: {}]   ;;  %s1963_s7 = inlined_call_operand.vmem [shape: f32[2,128,1], index: 7, kind: output, shape index: {}]  }
   0x1   :  { %s1562_s26 = smov 0  }
   0x2 LB: > { %s29_s27 = sadd.s32 1, %s1508_s25  ;;  %p1394_p0 = scmp.ge.s32.totalorder %s1512_s26, 1  ;;  %s1512_s26 = sphi %s1562_s26, %s17_s26   ;;  %s1508_s25 = sphi %s1560_s25, %s1965_s25   ;;  %s1504_s24 = sphi %s1558_s24, %s1964_s24  }
   0x3   : > { %p31_p1 = scmp.ge.s32.totalorder %s29_s27, 2  ;;  %p256_p2 = scmp.lt.s32.totalorder %s1512_s26, 3 }
   0x5   : > { %s1967_s27 = smov (%p31_p1, %s29_s27), 0  ;;  %p257_p3 = pnand %p1394_p0, %p256_p2 }
   0x6   : > { %v330_v0 = vld [vmem:[%s1957_s1] sm:$0xff] (!%p257_p3)  ;;  %v1514_v1 = vmov (!%p257_p3), 2   ;;  %v1515_v2 = vmov (!%p257_p3), 1   ;;  %v332_v3 = vld [vmem:[%s1957_s1 + $0x10] sm:$0xff] (!%p257_p3)  ;;  %v331_v4 = vld [vmem:[%s1957_s1 + $0x8] sm:$0xff] (!%p257_p3)  ;;  %v1516_v5 = vmov (!%p257_p3), 0   ;;  %v379_v47 = vlaneseq (!%p257_p3) }
   0x7   : > { %260 = sbr.rel (%p257_p3) target bundleno = 897 (0x381), region = 48  ;;  %1464 = vset.pattern.permute.xlu0 (!%p257_p3), %v1514_v1  ;;  %1463 = vset.pattern.permute.xlu1 (!%p257_p3), %v1515_v2  ;;  %v335_v6 = vld [vmem:[%s1957_s1 + $0x28] sm:$0xff] (!%p257_p3)  ;;  %v334_v7 = vld [vmem:[%s1957_s1 + $0x20] sm:$0xff] (!%p257_p3)  ;;  %v337_v8 = vld [vmem:[%s1957_s1 + $0x38] sm:$0xff] (!%p257_p3)  ;;  %p293_p4 = scmp.lt.s32.totalorder (!%p257_p3), %s1504_s24, 1  ;;  %vm741_vm0 = vcmask (!%p257_p3), 523264  }
   0x8   : > { %496 = vperm.xlu0 (!%p257_p3), %1464, %v330_v0   ;;  %414 = vperm.xlu1 (!%p257_p3), %1463, %v330_v0   ;;  %v333_v9 = vld [vmem:[%s1957_s1 + $0x18] sm:$0xff] (!%p257_p3)  ;;  %v577_v10 = vld [vmem:[%s1958_s2] sm:$0xff] (!%p257_p3)  ;;  %v578_v11 = vld [vmem:[%s1958_s2 + $0x8] sm:$0xff] (!%p257_p3)  ;;  %v380_v50 = vshrl.u32 (!%p257_p3), %v379_v47, 7  ;;  %vm312_vm1 = vcmask (!%p257_p3), 7168   ;;  %vm1188_vm2 = vcmask (!%p257_p3), 588800  }
   0x9   : > { %786 = vmatprep.mubr.bf16.mxu0 (!%p257_p3), %v1516_v5  ;;  %1079 = vmatprep.mubr.bf16.mxu1 (!%p257_p3), %v1516_v5  ;;  %v336_v12 = vld [vmem:[%s1957_s1 + $0x30] sm:$0xff] (!%p257_p3)  ;;  %v581_v13 = vld [vmem:[%s1958_s2 + $0x20] sm:$0xff] (!%p257_p3)  ;;  %v584_v14 = vld [vmem:[%s1958_s2 + $0x38] sm:$0xff] (!%p257_p3) }
   0xa   : > { %v674_v15 = vld [vmem:[%s1960_s4 + $0x8] sm:$0xff] (!%p257_p3)  ;;  %v676_v16 = vld [vmem:[%s1960_s4 + $0x18] sm:$0xff] (!%p257_p3)  ;;  %v579_v17 = vld [vmem:[%s1958_s2 + $0x10] sm:$0xff] (!%p257_p3)  ;;  %v447_v52 = vsub.s32 (!%p257_p3), 1, %v380_v50  ;;  %v451_v53 = vsub.s32 (!%p257_p3), 5, %v380_v50  ;;  %v381_v54 = vsub.s32 (!%p257_p3), 0, %v380_v50 }
   0xb   : > { %v678_v18 = vld [vmem:[%s1960_s4 + $0x28] sm:$0xff] (!%p257_p3)  ;;  %v580_v19 = vld [vmem:[%s1958_s2 + $0x18] sm:$0xff] (!%p257_p3)  ;;  %v583_v28 = vld [vmem:[%s1958_s2 + $0x30] sm:$0xff] (!%p257_p3)  ;;  %v385_v55 = vsub.s32 (!%p257_p3), 4, %v380_v50  ;;  %v529_v58 = vsub.s32 (!%p257_p3), 2, %v380_v50  ;;  %v533_v59 = vsub.s32 (!%p257_p3), 6, %v380_v50 }
   0xc   : > { %504 = vperm.xlu0 (!%p257_p3), %1464, %v332_v3   ;;  %418 = vperm.xlu1 (!%p257_p3), %1463, %v331_v4   ;;  %v680_v20 = vld [vmem:[%s1960_s4 + $0x38] sm:$0xff] (!%p257_p3)  ;;  %v868_v21 = vld [vmem:[%s1962_s6 + $0x8] sm:$0xff] (!%p257_p3)  ;;  %v673_v30 = vld [vmem:[%s1960_s4] sm:$0xff] (!%p257_p3) }
   0xd   : > { %v870_v22 = vld [vmem:[%s1962_s6 + $0x18] sm:$0xff] (!%p257_p3)  ;;  %v872_v23 = vld [vmem:[%s1962_s6 + $0x28] sm:$0xff] (!%p257_p3)  ;;  %v675_v32 = vld [vmem:[%s1960_s4 + $0x10] sm:$0xff] (!%p257_p3) }
   0xe   : > { %v874_v24 = vld [vmem:[%s1962_s6 + $0x38] sm:$0xff]  ;;  %v876_v25 = vld [vmem:[%s1962_s6 + $0x48] sm:$0xff]  ;;  %v677_v33 = vld [vmem:[%s1960_s4 + $0x20] sm:$0xff]  ;;  %s1969_s24 = smov (!%p293_p4, %s1504_s24), 1 }
   0xf   : > { %v582_v26 = vld [vmem:[%s1958_s2 + $0x28] sm:$0xff]  ;;  %v878_v27 = vld [vmem:[%s1962_s6 + $0x58] sm:$0xff]  ;;  %v679_v34 = vld [vmem:[%s1960_s4 + $0x30] sm:$0xff]  ;;  %s1425_s9 = sshll.u32 %s1969_s24, 3  ;;  %s1426_s18 = sshll.u32 %s1969_s24, 7 }
  0x10   : > { %516 = vperm.xlu0 %1464, %v335_v6   ;;  %1465 = vset.pattern.permute.xlu1 %v1514_v1  ;;  %v880_v29 = vld [vmem:[%s1962_s6 + $0x68] sm:$0xff]  ;;  %v882_v31 = vld [vmem:[%s1962_s6 + $0x78] sm:$0xff]  ;;  %v867_v35 = vld [vmem:[%s1962_s6] sm:$0xff]  ;;  %s300_s12 = scalar_lea.vmem %s1956_s0, %s1425_s9  ;;  %s1901_s21 = scalar_lea.vmem %s1963_s7, %s1426_s18 }
  0x11   : > { %500 = vperm.xlu1 %1465, %v331_v4   ;;  %v869_v36 = vld [vmem:[%s1962_s6 + $0x10] sm:$0xff]  ;;  %v871_v37 = vld [vmem:[%s1962_s6 + $0x20] sm:$0xff] }
  0x12   : > { %v873_v38 = vld [vmem:[%s1962_s6 + $0x30] sm:$0xff]  ;;  %v875_v39 = vld [vmem:[%s1962_s6 + $0x40] sm:$0xff] }
  0x13   : > { %v877_v40 = vld [vmem:[%s1962_s6 + $0x50] sm:$0xff]  ;;  %v879_v43 = vld [vmem:[%s1962_s6 + $0x60] sm:$0xff] }
  0x14   : > { %1472 = vset.pattern.permute.xlu0 %v1515_v2  ;;  %v881_v46 = vld [vmem:[%s1962_s6 + $0x70] sm:$0xff]  ;;  %v329_v57 = vld [vmem:[%s300_s12] sm:$0x77] }
  0x15   : > { %430 = vperm.xlu0 %1472, %v334_v7   ;;  %1466 = vset.pattern.permute.xlu1 %v1516_v5  ;;  %v448_v61 = vrot.slane %v329_v57, %v447_v52  ;;  %v452_v62 = vrot.slane %v329_v57, %v451_v53  ;;  %v382_v63 = vrot.slane %v329_v57, %v381_v54 }
  0x16   : > { %350 = vperm.xlu1 %1466, %v332_v3  }
  0x19   : > { %442 = vperm.xlu0 %1472, %v337_v8  }
  0x1a   : > { %1467 = vset.pattern.permute.xlu1 %v1515_v2 }
  0x1b   : > { %422 = vperm.xlu1 %1467, %v332_v3   ;;  %v534_v3 = vrot.slane %v329_v57, %v533_v59 }
  0x1d   : > { %1475 = vset.pattern.permute.xlu0 %v1516_v5 }
  0x1e   : > { %340 = vperm.xlu0 %1475, %v330_v0   ;;  %v386_v0 = vrot.slane %v329_v57, %v385_v55 }
  0x1f   : > { %426 = vperm.xlu1 %1467, %v333_v9  }
  0x22   : > { %345 = vperm.xlu0 %1475, %v331_v4   ;;  %v1733_v4 = vrot.slane %v448_v61, %v447_v52 }
  0x23   : > { %1468 = vset.pattern.permute.xlu1 %v1514_v1 }
  0x24   : > { %508 = vperm.xlu1 %1468, %v333_v9  }
  0x26   : > { %355 = vperm.xlu0 %1475, %v333_v9  }
  0x28   : > { %1469 = vset.pattern.permute.xlu1 %v1516_v5 }
  0x29   : > { %587 = vperm.xlu1 %1469, %v577_v10  }
  0x2a   : > { %592 = vperm.xlu0 %1475, %v578_v11  }
  0x2d   : > { %360 = vperm.xlu1 %1469, %v334_v7  }
  0x2e   : > { %370 = vperm.xlu0 %1475, %v336_v12  }
  0x31   : > { %365 = vperm.xlu1 %1469, %v335_v6  }
  0x32   : > { %607 = vperm.xlu0 %1475, %v581_v13  }
  0x35   : > { %1470 = vset.pattern.permute.xlu1 %v1515_v2 }
  0x36   : > { %622 = vperm.xlu0 %1475, %v584_v14   ;;  %434 = vperm.xlu1 %1470, %v335_v6   ;;  %v1735_v6 = vrot.slane %v452_v62, %v447_v52 }
  0x3a   : > { %688 = vperm.xlu0 %1475, %v674_v15   ;;  %1471 = vset.pattern.permute.xlu1 %v1514_v1 }
  0x3b   : > { %512 = vperm.xlu1 %1471, %v334_v7   ;;  %v1737_v7 = vrot.slane %v382_v63, %v381_v54 }
  0x3e   : > { %698 = vperm.xlu0 %1475, %v676_v16   ;;  %v1747_v16 = vrot.slane %v534_v3, %v529_v58 }
  0x3f   : > { %1473 = vset.pattern.permute.xlu1 %v1516_v5 }
  0x40   : > { %597 = vperm.xlu1 %1473, %v579_v17  }
  0x42   : > { %708 = vperm.xlu0 %1475, %v678_v18  }
  0x44   : > { %602 = vperm.xlu1 %1473, %v580_v19  }
  0x46   : > { %718 = vperm.xlu0 %1475, %v680_v20  }
  0x48   : > { %375 = vperm.xlu1 %1473, %v337_v8  }
  0x4a   : > { %890 = vperm.xlu0 %1475, %v868_v21  }
  0x4c   : > { %1474 = vset.pattern.permute.xlu1 %v1515_v2  ;;  %v530_v2 = vrot.slane %v329_v57, %v529_v58 }
  0x4d   : > { %438 = vperm.xlu1 %1474, %v336_v12  }
  0x4e   : > { %900 = vperm.xlu0 %1475, %v870_v22   ;;  %v1745_v15 = vrot.slane %v530_v2, %v529_v58 }
  0x51   : > { %1476 = vset.pattern.permute.xlu1 %v1514_v1 }
  0x52   : > { %910 = vperm.xlu0 %1475, %v872_v23   ;;  %520 = vperm.xlu1 %1476, %v336_v12  }
  0x56   : > { %920 = vperm.xlu0 %1475, %v874_v24   ;;  %524 = vperm.xlu1 %1476, %v337_v8   ;;  %v1739_v8 = vrot.slane %v386_v0, %v381_v54 }
  0x5a   : > { %930 = vperm.xlu0 %1475, %v876_v25   ;;  %1477 = vset.pattern.permute.xlu1 %v1516_v5 }
  0x5b   : > { %612 = vperm.xlu1 %1477, %v582_v26  }
  0x5e   : > { %940 = vperm.xlu0 %1475, %v878_v27  }
  0x5f   : > { %617 = vperm.xlu1 %1477, %v583_v28  }
  0x62   : > { %950 = vperm.xlu0 %1475, %v880_v29  }
  0x63   : > { %683 = vperm.xlu1 %1477, %v673_v30  }
  0x66   : > { %960 = vperm.xlu0 %1475, %v882_v31  }
  0x67   : > { %693 = vperm.xlu1 %1477, %v675_v32  }
  0x6b   : > { %703 = vperm.xlu1 %1477, %v677_v33  }
  0x6f   : > { %713 = vperm.xlu1 %1477, %v679_v34  }
  0x73   : > { %885 = vperm.xlu1 %1477, %v867_v35  }
  0x77   : > { %895 = vperm.xlu1 %1477, %v869_v36  }
  0x7b   : > { %905 = vperm.xlu1 %1477, %v871_v37  }
  0x7f   : > { %915 = vperm.xlu1 %1477, %v873_v38  }
  0x83   : > { %925 = vperm.xlu1 %1477, %v875_v39  }
  0x87   : > { %935 = vperm.xlu1 %1477, %v877_v40   ;;  %v415_v41 = vpop.permute.xlu1 %414  ;;  %v497_v42 = vpop.permute.xlu0 %496 }
  0x88   : > { %v463_v13 = vmul.f32 %v1733_v4, %v415_v41  ;;  %v464_v14 = vmul.f32 %v1735_v6, %v415_v41  ;;  %v545_v22 = vmul.f32 %v1745_v15, %v497_v42  ;;  %v546_v23 = vmul.f32 %v1747_v16, %v497_v42 }
  0x8b   : > { %945 = vperm.xlu1 %1477, %v879_v43   ;;  %v419_v44 = vpop.permute.xlu1 %418  ;;  %v1713_v45 = vpop.permute.xlu0 %504 }
  0x8c   : > { %v465_v18 = vmul.f32 %v1733_v4, %v419_v44  ;;  %v466_v19 = vmul.f32 %v1735_v6, %v419_v44  ;;  %v549_v63 = vmul.f32 %v1745_v15, %v1713_v45  ;;  %v550_v0 = vmul.f32 %v1747_v16, %v1713_v45 }
  0x8f   : > { %955 = vperm.xlu1 %1477, %v881_v46   ;;  %v1721_v48 = vpop.permute.xlu0 %516 }
  0x90   : > { %v501_v49 = vpop.permute.xlu1 %500 }
  0x91   : > { %v547_v30 = vmul.f32 %v1745_v15, %v501_v49  ;;  %v548_v31 = vmul.f32 %v1747_v16, %v501_v49 }
  0x94   : > { %v1727_v51 = vpop.permute.xlu0 %430 }
  0x95   : > { %v1729_v56 = vpop.permute.xlu1 %350 }
  0x96   : > { %v401_v57 = vmul.f32 %v1737_v7, %v1729_v56  ;;  %v402_v58 = vmul.f32 %v1739_v8, %v1729_v56 }
  0x98   : > { %v1731_v60 = vpop.permute.xlu0 %442 }
  0x9a   : > { %v423_v1 = vpop.permute.xlu1 %422 }
  0x9b   : > { %v467_v54 = vmul.f32 %v1733_v4, %v423_v1  ;;  %v468_v55 = vmul.f32 %v1735_v6, %v423_v1 }
  0x9d   : > { %v341_v9 = vpop.permute.xlu0 %340  ;;  %v483_v2 = vadd.f32 %v467_v54, %v401_v57  ;;  %v484_v3 = vadd.f32 %v468_v55, %v402_v58  ;;  %v478_v57 = vmul.f32 %v1735_v6, %v1731_v60 }
  0x9e   : > { %v427_v10 = vpop.permute.xlu1 %426  ;;  %v397_v11 = vmul.f32 %v1737_v7, %v341_v9  ;;  %v398_v12 = vmul.f32 %v1739_v8, %v341_v9 }
  0x9f   : > { %v469_v1 = vmul.f32 %v1733_v4, %v427_v10  ;;  %v470_v9 = vmul.f32 %v1735_v6, %v427_v10 }
  0xa0   : > { %v479_v24 = vadd.f32 %v463_v13, %v397_v11  ;;  %v480_v25 = vadd.f32 %v464_v14, %v398_v12 }
  0xa1   : > { %v346_v17 = vpop.permute.xlu0 %345 }
  0xa2   : > { %v399_v20 = vmul.f32 %v1737_v7, %v346_v17  ;;  %v400_v21 = vmul.f32 %v1739_v8, %v346_v17  ;;  %v561_v32 = vadd.f32 %v545_v22, %v479_v24  ;;  %v562_v33 = vadd.f32 %v546_v23, %v480_v25 }
  0xa3   : > { %v509_v26 = vpop.permute.xlu1 %508  ;;  %v565_v17 = vadd.f32 %v549_v63, %v483_v2 }
  0xa4   : > { %v481_v27 = vadd.f32 %v465_v18, %v399_v20  ;;  %v482_v28 = vadd.f32 %v466_v19, %v400_v21  ;;  %v551_v13 = vmul.f32 %v1745_v15, %v509_v26  ;;  %v552_v14 = vmul.f32 %v1747_v16, %v509_v26 }
  0xa5   : > { %v356_v29 = vpop.permute.xlu0 %355  ;;  %v566_v18 = vadd.f32 %v550_v0, %v484_v3  ;;  %v471_v26 = vmul.f32 %v1733_v4, %v1727_v51 }
  0xa6   : > { %v563_v35 = vadd.f32 %v547_v30, %v481_v27  ;;  %v564_v36 = vadd.f32 %v548_v31, %v482_v28  ;;  %v403_v59 = vmul.f32 %v1737_v7, %v356_v29  ;;  %v404_v61 = vmul.f32 %v1739_v8, %v356_v29 }
  0xa8   : > { %v588_v34 = vpop.permute.xlu1 %587  ;;  %v485_v11 = vadd.f32 %v469_v1, %v403_v59  ;;  %v486_v12 = vadd.f32 %v470_v9, %v404_v61 }
  0xa9   : > { %v625_v37 = vadd.f32 %v588_v34, %v561_v32  ;;  %v626_v38 = vadd.f32 %v588_v34, %v562_v33  ;;  %v593_v39 = vpop.permute.xlu0 %592  ;;  %v472_v33 = vmul.f32 %v1735_v6, %v1727_v51 }
  0xaa   : > { %v627_v40 = vadd.f32 %v593_v39, %v563_v35  ;;  %v628_v41 = vadd.f32 %v593_v39, %v564_v36  ;;  %v567_v21 = vadd.f32 %v551_v13, %v485_v11  ;;  %v568_v22 = vadd.f32 %v552_v14, %v486_v12 }
  0xab   : > { %v641_v42 = vmax.f32 %v625_v37, 0.0  ;;  %v642_v43 = vmax.f32 %v626_v38, 0.0 }
  0xac   : > { %v643_v44 = vmax.f32 %v627_v40, 0.0  ;;  %v361_v46 = vpop.permute.xlu1 %360  ;;  %v644_v47 = vmax.f32 %v628_v41, 0.0 }
  0xad   : > { %v405_v34 = vmul.f32 %v1737_v7, %v361_v46  ;;  %v406_v35 = vmul.f32 %v1739_v8, %v361_v46  ;;  %v371_v36 = vpop.permute.xlu0 %370 }
  0xae   : > { %v666_v50 = vpack.c.bf16 %v644_v47, %v642_v43  ;;  %v665_v52 = vpack.c.bf16 %v643_v44, %v641_v42  ;;  %v409_v2 = vmul.f32 %v1737_v7, %v371_v36  ;;  %v410_v3 = vmul.f32 %v1739_v8, %v371_v36  ;;  %v1478_v36 = vld [vmem:[%s1959_s3] sm:$0xff]  }
  0xaf   : > { %v487_v42 = vadd.f32 %v471_v26, %v405_v34  ;;  %v488_v43 = vadd.f32 %v472_v33, %v406_v35 }
  0xb0   : > { %v366_v53 = vpop.permute.xlu1 %365  ;;  %754 = vmatprep.subr.bf16.mxu0 %v666_v50  ;;  %v555_v50 = vmul.f32 %v1745_v15, %v1721_v48 }
  0xb1   : > { %755 = vmatpush1.bf16.msra.mxu0 %v665_v52  ;;  %v407_v44 = vmul.f32 %v1737_v7, %v366_v53  ;;  %v408_v51 = vmul.f32 %v1739_v8, %v366_v53  ;;  %v556_v52 = vmul.f32 %v1747_v16, %v1721_v48  ;;  %v608_v61 = vpop.permute.xlu0 %607 }
  0xb5   : > { %v435_v49 = vpop.permute.xlu1 %434 }
  0xb6   : > { %v473_v39 = vmul.f32 %v1733_v4, %v435_v49  ;;  %v474_v40 = vmul.f32 %v1735_v6, %v435_v49  ;;  %v477_v49 = vmul.f32 %v1733_v4, %v1731_v60 }
  0xb8   : > { %v489_v58 = vadd.f32 %v473_v39, %v407_v44  ;;  %v490_v53 = vadd.f32 %v474_v40, %v408_v51  ;;  %v1481_v39 = vld [vmem:[%s1959_s3 + $0x18] sm:$0xff]  }
  0xba   : > { %v513_v62 = vpop.permute.xlu1 %512  ;;  %v571_v14 = vadd.f32 %v555_v50, %v489_v58 }
  0xbb   : > { %v553_v37 = vmul.f32 %v1745_v15, %v513_v62  ;;  %v554_v38 = vmul.f32 %v1747_v16, %v513_v62 }
  0xbd   : > { %v569_v54 = vadd.f32 %v553_v37, %v487_v42  ;;  %v570_v55 = vadd.f32 %v554_v38, %v488_v43  ;;  %v1479_v37 = vld [vmem:[%s1959_s3 + $0x8] sm:$0xff]   ;;  %v1480_v38 = vld [vmem:[%s1959_s3 + $0x10] sm:$0xff]  }
  0xbf   : > { %v598_v56 = vpop.permute.xlu1 %597  ;;  %v633_v11 = vadd.f32 %v608_v61, %v569_v54  ;;  %v634_v60 = vadd.f32 %v608_v61, %v570_v55 }
  0xc0   : > { %v629_v19 = vadd.f32 %v598_v56, %v565_v17  ;;  %v630_v20 = vadd.f32 %v598_v56, %v566_v18 }
  0xc2   : > { %v645_v25 = vmax.f32 %v629_v19, 0.0  ;;  %v646_v27 = vmax.f32 %v630_v20, 0.0 }
  0xc3   : > { %v603_v45 = vpop.permute.xlu1 %602 }
  0xc4   : > { %v631_v23 = vadd.f32 %v603_v45, %v567_v21  ;;  %v632_v24 = vadd.f32 %v603_v45, %v568_v22  ;;  %v650_v45 = vmax.f32 %v634_v60, 0.0 }
  0xc6   : > { %v647_v28 = vmax.f32 %v631_v23, 0.0  ;;  %v648_v10 = vmax.f32 %v632_v24, 0.0  ;;  %v649_v23 = vmax.f32 %v633_v11, 0.0 }
  0xc7   : > { %v376_v29 = vpop.permute.xlu1 %375 }
  0xc8   : > { %v668_v30 = vpack.c.bf16 %v648_v10, %v646_v27  ;;  %v667_v31 = vpack.c.bf16 %v647_v28, %v645_v25  ;;  %v411_v47 = vmul.f32 %v1737_v7, %v376_v29  ;;  %v412_v46 = vmul.f32 %v1739_v8, %v376_v29  ;;  %v623_v7 = vpop.permute.xlu0 %622 }
  0xca   : > { %756 = vmatprep.subr.bf16.mxu0 %v668_v30  ;;  %v493_v1 = vadd.f32 %v477_v49, %v411_v47  ;;  %v494_v9 = vadd.f32 %v478_v57, %v412_v46 }
  0xcb   : > { %757 = vmatpush1.bf16.msra.mxu0 %v667_v31 }
  0xcc   : > { %v439_v32 = vpop.permute.xlu1 %438  ;;  %v689_v44 = vpop.permute.xlu0 %688 }
  0xcd   : > { %v475_v62 = vmul.f32 %v1733_v4, %v439_v32  ;;  %v476_v63 = vmul.f32 %v1735_v6, %v439_v32  ;;  %v572_v6 = vadd.f32 %v556_v52, %v490_v53 }
  0xcf   : > { %v491_v17 = vadd.f32 %v475_v62, %v409_v2  ;;  %v492_v18 = vadd.f32 %v476_v63, %v410_v3 }
  0xd1   : > { %v521_v41 = vpop.permute.xlu1 %520 }
  0xd2   : > { %v557_v12 = vmul.f32 %v1745_v15, %v521_v41  ;;  %v558_v56 = vmul.f32 %v1747_v16, %v521_v41 }
  0xd4   : > { %v573_v22 = vadd.f32 %v557_v12, %v491_v17  ;;  %v574_v8 = vadd.f32 %v558_v56, %v492_v18 }
  0xd5   : > { %v525_v59 = vpop.permute.xlu1 %524 }
  0xd6   : > { %v559_v0 = vmul.f32 %v1745_v15, %v525_v59  ;;  %v560_v48 = vmul.f32 %v1747_v16, %v525_v59 }
  0xd8   : > { %v575_v13 = vadd.f32 %v559_v0, %v493_v1  ;;  %v576_v4 = vadd.f32 %v560_v48, %v494_v9  ;;  %v699_v0 = vpop.permute.xlu0 %698 }
  0xda   : > { %v613_v19 = vpop.permute.xlu1 %612  ;;  %v639_v24 = vadd.f32 %v623_v7, %v575_v13  ;;  %v640_v25 = vadd.f32 %v623_v7, %v576_v4 }
  0xdb   : > { %v635_v20 = vadd.f32 %v613_v19, %v571_v14  ;;  %v636_v21 = vadd.f32 %v613_v19, %v572_v6 }
  0xdc   : > { %v656_v26 = vmax.f32 %v640_v25, 0.0  ;;  %v655_v33 = vmax.f32 %v639_v24, 0.0  ;;  %v709_v19 = vpop.permute.xlu0 %708 }
  0xdd   : > { %v651_v27 = vmax.f32 %v635_v20, 0.0  ;;  %v652_v15 = vmax.f32 %v636_v21, 0.0 }
  0xde   : > { %v618_v28 = vpop.permute.xlu1 %617 }
  0xdf   : > { %v637_v16 = vadd.f32 %v618_v28, %v573_v22  ;;  %v638_v10 = vadd.f32 %v618_v28, %v574_v8  ;;  %v670_v29 = vpack.c.bf16 %v652_v15, %v650_v45  ;;  %v669_v30 = vpack.c.bf16 %v651_v27, %v649_v23 }
  0xe1   : > { %v653_v31 = vmax.f32 %v637_v16, 0.0  ;;  %v654_v32 = vmax.f32 %v638_v10, 0.0  ;;  %758 = vmatprep.subr.bf16.mxu0 %v670_v29 }
  0xe2   : > { %759 = vmatpush1.bf16.msra.mxu0 %v669_v30  ;;  %v684_v40 = vpop.permute.xlu1 %683  ;;  %v719_v30 = vpop.permute.xlu0 %718 }
  0xe3   : > { %v672_v34 = vpack.c.bf16 %v656_v26, %v654_v32  ;;  %v671_v35 = vpack.c.bf16 %v655_v33, %v653_v31 }
  0xe5   : > { %760 = vmatprep.subr.bf16.mxu0 %v672_v34 }
  0xe6   : > { %761 = vmatpush1.bf16.msra.mxu0 %v671_v35  ;;  %v694_v53 = vpop.permute.xlu1 %693 }
  0xe9   : > { %1403 = vmatmul.mubr.msk.bf16.vlgmr.msra.gmra.mrb[0].mxu0 %vm741_vm0, %v1478_v36 }
  0xea   : > { %796 = vmatprep.mubr.bf16.mxu0 %v1516_v5  ;;  %v704_v4 = vpop.permute.xlu1 %703 }
  0xee   : > { %v714_v15 = vpop.permute.xlu1 %713 }
  0xf1   : > { %1404 = vmatmul.mubr.msk.bf16.gmra.mrb[4].mxu0 %vm741_vm0, %v1479_v37 }
  0xf2   : > { %806 = vmatprep.mubr.bf16.mxu0 %v1516_v5 }
  0xf9   : > { %1405 = vmatmul.mubr.msk.bf16.gmra.mrb[8].mxu0 %vm741_vm0, %v1480_v38 }
  0xfa   : > { %816 = vmatprep.mubr.bf16.mxu0 %v1516_v5 }
 0x101   : > { %1406 = vmatmul.mubr.msk.bf16.gmra.mrb[12].mxu0 %vm741_vm0, %v1481_v39 }
 0x102   : > { %1059 = vmatprep.mubr.bf16.mxu0 %v1516_v5 }
 0x1bc   : > { %v788_v41 = vpop.f32.mrb[0].mxu0 }
 0x1bd   : > { %v789_v42 = vadd.f32 %v788_v41, %v684_v40  ;;  %v790_v43 = vpop.f32.mrb[1].mxu0  ;;  %v1482_v41 = vld [vmem:[%s1961_s5] sm:$0xff]  }
 0x1be   : > { %v791_v51 = vadd.f32 %v790_v43, %v684_v40  ;;  %v792_v47 = vpop.f32.mrb[2].mxu0  ;;  %v1484_v43 = vld [vmem:[%s1961_s5 + $0x8] sm:$0xff]  }
 0x1bf   : > { %v793_v46 = vadd.f32 %v792_v47, %v689_v44  ;;  %v794_v50 = vpop.f32.mrb[3].mxu0  ;;  %v827_v54 = vmax.f32 %v789_v42, 0.0  ;;  %v1483_v42 = vld [vmem:[%s1961_s5 + $0x10] sm:$0xff]   ;;  %v1487_v47 = vld [vmem:[%s1961_s5 + $0x28] sm:$0xff]  }
 0x1c0   : > { %v795_v52 = vadd.f32 %v794_v50, %v689_v44  ;;  %v828_v49 = vmax.f32 %v791_v51, 0.0  ;;  %v1485_v44 = vld [vmem:[%s1961_s5 + $0x18] sm:$0xff]   ;;  %v1486_v51 = vld [vmem:[%s1961_s5 + $0x20] sm:$0xff]  }
 0x1c1   : > { %v829_v55 = vmax.f32 %v793_v46, 0.0  ;;  %v1488_v46 = vld [vmem:[%s1961_s5 + $0x30] sm:$0xff]   ;;  %v1489_v50 = vld [vmem:[%s1961_s5 + $0x38] sm:$0xff]  }
 0x1c2   : > { %v830_v57 = vmax.f32 %v795_v52, 0.0  ;;  %v1517_v52 = vmov 0.0  }
 0x1c3   : > { %v859_v58 = vpack.c.bf16 %v829_v55, %v827_v54  ;;  %317 = vst.msk [vmem:[#allocation2 + $0x20] sm:$0xff] %vm312_vm1, %v1517_v52  ;;  %313 = vst.msk [vmem:[#allocation2] sm:$0xff] %vm312_vm1, %v1517_v52  ;;  %v886_v54 = vpop.permute.xlu1 %885 }
 0x1c4   : > { %v860_v59 = vpack.c.bf16 %v830_v57, %v828_v49  ;;  %v798_v61 = vpop.f32.mrb[4].mxu0  ;;  %314 = vst.msk [vmem:[#allocation2 + $0x8] sm:$0xff] %vm312_vm1, %v1517_v52  ;;  %315 = vst.msk [vmem:[#allocation2 + $0x10] sm:$0xff] %vm312_vm1, %v1517_v52 }
 0x1c5   : > { %v799_v62 = vadd.f32 %v798_v61, %v694_v53  ;;  %v800_v63 = vpop.f32.mrb[5].mxu0  ;;  %316 = vst.msk [vmem:[#allocation2 + $0x18] sm:$0xff] %vm312_vm1, %v1517_v52  ;;  %318 = vst.msk [vmem:[#allocation2 + $0x28] sm:$0xff] %vm312_vm1, %v1517_v52 }
 0x1c6   : > { %v801_v48 = vadd.f32 %v800_v63, %v694_v53  ;;  %v802_v2 = vpop.f32.mrb[6].mxu0  ;;  %1027 = vmatprep.subr.bf16.mxu0 %v860_v59  ;;  %1427 = vmatprep.subr.bf16.mxu1 %v860_v59  ;;  %319 = vst.msk [vmem:[#allocation2 + $0x30] sm:$0xff] %vm312_vm1, %v1517_v52  ;;  %320 = vst.msk [vmem:[#allocation2 + $0x38] sm:$0xff] %vm312_vm1, %v1517_v52 }
 0x1c7   : > { %v803_v3 = vadd.f32 %v802_v2, %v699_v0  ;;  %v804_v1 = vpop.f32.mrb[7].mxu0  ;;  %1028 = vmatpush1.bf16.msra.mxu0 %v859_v58  ;;  %1431 = vmatpush1.bf16.msra.mxu1 %v859_v58  ;;  %v831_v11 = vmax.f32 %v799_v62, 0.0  ;;  %321 = vst.msk [vmem:[#allocation2 + $0x40] sm:$0xff] %vm312_vm1, %v1517_v52  ;;  %322 = vst.msk [vmem:[#allocation2 + $0x48] sm:$0xff] %vm312_vm1, %v1517_v52  ;;  %v896_v49 = vpop.permute.xlu1 %895 }
 0x1c8   : > { %v805_v9 = vadd.f32 %v804_v1, %v699_v0  ;;  %v832_v12 = vmax.f32 %v801_v48, 0.0  ;;  %323 = vst.msk [vmem:[#allocation2 + $0x50] sm:$0xff] %vm312_vm1, %v1517_v52  ;;  %324 = vst.msk [vmem:[#allocation2 + $0x58] sm:$0xff] %vm312_vm1, %v1517_v52 }
 0x1c9   : > { %v833_v60 = vmax.f32 %v803_v3, 0.0  ;;  %325 = vst.msk [vmem:[#allocation2 + $0x60] sm:$0xff] %vm312_vm1, %v1517_v52  ;;  %326 = vst.msk [vmem:[#allocation2 + $0x68] sm:$0xff] %vm312_vm1, %v1517_v52 }
 0x1ca   : > { %v834_v56 = vmax.f32 %v805_v9, 0.0  ;;  %327 = vst.msk [vmem:[#allocation2 + $0x70] sm:$0xff] %vm312_vm1, %v1517_v52  ;;  %328 = vst.msk [vmem:[#allocation2 + $0x78] sm:$0xff] %vm312_vm1, %v1517_v52 }
 0x1cb   : > { %v861_v13 = vpack.c.bf16 %v833_v60, %v831_v11  ;;  %v906_v58 = vpop.permute.xlu1 %905 }
 0x1cc   : > { %v862_v14 = vpack.c.bf16 %v834_v56, %v832_v12  ;;  %v808_v6 = vpop.f32.mrb[8].mxu0 }
 0x1cd   : > { %v809_v17 = vadd.f32 %v808_v6, %v704_v4  ;;  %v810_v18 = vpop.f32.mrb[9].mxu0 }
 0x1ce   : > { %v811_v20 = vadd.f32 %v810_v18, %v704_v4  ;;  %v812_v21 = vpop.f32.mrb[10].mxu0  ;;  %1029 = vmatprep.subr.bf16.mxu0 %v862_v14  ;;  %1428 = vmatprep.subr.bf16.mxu1 %v862_v14 }
 0x1cf   : > { %v813_v7 = vadd.f32 %v812_v21, %v709_v19  ;;  %v814_v22 = vpop.f32.mrb[11].mxu0  ;;  %1030 = vmatpush1.bf16.msra.mxu0 %v861_v13  ;;  %1432 = vmatpush1.bf16.msra.mxu1 %v861_v13  ;;  %v835_v45 = vmax.f32 %v809_v17, 0.0 }
 0x1d0   : > { %v815_v8 = vadd.f32 %v814_v22, %v709_v19  ;;  %v836_v24 = vmax.f32 %v811_v20, 0.0  ;;  %v916_v22 = vpop.permute.xlu1 %915 }
 0x1d1   : > { %v837_v23 = vmax.f32 %v813_v7, 0.0 }
 0x1d2   : > { %v838_v25 = vmax.f32 %v815_v8, 0.0 }
 0x1d3   : > { %v863_v27 = vpack.c.bf16 %v837_v23, %v835_v45 }
 0x1d4   : > { %v864_v28 = vpack.c.bf16 %v838_v25, %v836_v24  ;;  %v818_v16 = vpop.f32.mrb[12].mxu0 }
 0x1d5   : > { %v819_v10 = vadd.f32 %v818_v16, %v714_v15  ;;  %v820_v29 = vpop.f32.mrb[13].mxu0 }
 0x1d6   : > { %v821_v31 = vadd.f32 %v820_v29, %v714_v15  ;;  %v822_v32 = vpop.f32.mrb[14].mxu0  ;;  %1031 = vmatprep.subr.bf16.mxu0 %v864_v28  ;;  %1429 = vmatprep.subr.bf16.mxu1 %v864_v28 }
 0x1d7   : > { %v823_v26 = vadd.f32 %v822_v32, %v719_v30  ;;  %v824_v33 = vpop.f32.mrb[15].mxu0  ;;  %1032 = vmatpush1.bf16.msra.mxu0 %v863_v27  ;;  %1433 = vmatpush1.bf16.msra.mxu1 %v863_v27  ;;  %v839_v35 = vmax.f32 %v819_v10, 0.0 }
 0x1d8   : > { %v825_v34 = vadd.f32 %v824_v33, %v719_v30  ;;  %v840_v37 = vmax.f32 %v821_v31, 0.0 }
 0x1d9   : > { %v841_v36 = vmax.f32 %v823_v26, 0.0 }
 0x1da   : > { %v842_v38 = vmax.f32 %v825_v34, 0.0 }
 0x1db   : > { %v865_v39 = vpack.c.bf16 %v841_v36, %v839_v35 }
 0x1dc   : > { %v866_v40 = vpack.c.bf16 %v842_v38, %v840_v37 }
 0x1de   : > { %1033 = vmatprep.subr.bf16.mxu0 %v866_v40  ;;  %1430 = vmatprep.subr.bf16.mxu1 %v866_v40 }
 0x1df   : > { %1034 = vmatpush1.bf16.msra.mxu0 %v865_v39  ;;  %1434 = vmatpush1.bf16.msra.mxu1 %v865_v39 }
 0x1e2   : > { %1415 = vmatmul.mubr.msk.bf16.vlgmr.msra.gmra.mrb[16].mxu0 %vm741_vm0, %v1482_v41  ;;  %1417 = vmatmul.mubr.msk.bf16.vlgmr.msra.gmra.mrb[0].mxu1 %vm741_vm0, %v1483_v42 }
 0x1e3   : > { %1069 = vmatprep.mubr.bf16.mxu0 %v1516_v5  ;;  %1089 = vmatprep.mubr.bf16.mxu1 %v1516_v5 }
 0x1ea   : > { %1416 = vmatmul.mubr.msk.bf16.gmra.mrb[20].mxu0 %vm741_vm0, %v1484_v43  ;;  %1418 = vmatmul.mubr.msk.bf16.gmra.mrb[4].mxu1 %vm741_vm0, %v1485_v44 }
 0x1eb   : > { %1099 = vmatprep.mubr.bf16.mxu1 %v1516_v5 }
 0x1f2   : > { %1419 = vmatmul.mubr.msk.bf16.gmra.mrb[8].mxu1 %vm741_vm0, %v1486_v51 }
 0x1f3   : > { %1109 = vmatprep.mubr.bf16.mxu1 %v1516_v5 }
 0x1fa   : > { %1420 = vmatmul.mubr.msk.bf16.gmra.mrb[12].mxu1 %vm741_vm0, %v1487_v47 }
 0x1fb   : > { %1119 = vmatprep.mubr.bf16.mxu1 %v1516_v5 }
 0x202   : > { %1421 = vmatmul.mubr.msk.bf16.gmra.mrb[16].mxu1 %vm741_vm0, %v1488_v46 }
 0x203   : > { %1129 = vmatprep.mubr.bf16.mxu1 %v1516_v5  ;;  %v891_v5 = vpop.permute.xlu0 %890 }
 0x207   : > { %v901_v55 = vpop.permute.xlu0 %900 }
 0x20a   : > { %1422 = vmatmul.mubr.msk.bf16.gmra.mrb[20].mxu1 %vm741_vm0, %v1489_v50 }
 0x20b   : > { %v911_v57 = vpop.permute.xlu0 %910 }
 0x20f   : > { %v921_v7 = vpop.permute.xlu0 %920 }
 0x2b5   : > { %v1061_v53 = vpop.f32.mrb[16].mxu0  ;;  %v1081_v59 = vpop.f32.mrb[0].mxu1 }
 0x2b6   : > { %v1062_v61 = vadd.f32 %v1061_v53, %v886_v54  ;;  %v1082_v62 = vadd.f32 %v1081_v59, %v906_v58  ;;  %v1063_v63 = vpop.f32.mrb[17].mxu0  ;;  %v1083_v0 = vpop.f32.mrb[1].mxu1 }
 0x2b7   : > { %v1064_v48 = vadd.f32 %v1063_v63, %v886_v54  ;;  %v1084_v2 = vadd.f32 %v1083_v0, %v906_v58  ;;  %v1065_v3 = vpop.f32.mrb[18].mxu0  ;;  %v1085_v1 = vpop.f32.mrb[2].mxu1 }
 0x2b8   : > { %v1066_v9 = vadd.f32 %v1065_v3, %v891_v5  ;;  %v1086_v11 = vadd.f32 %v1085_v1, %v911_v57  ;;  %v1067_v60 = vpop.f32.mrb[19].mxu0  ;;  %v1087_v12 = vpop.f32.mrb[3].mxu1  ;;  %v1140_v6 = vmax.f32 %v1062_v61, 0.0  ;;  %v1148_v17 = vmax.f32 %v1082_v62, 0.0 }
 0x2b9   : > { %v1141_v56 = vmax.f32 %v1064_v48, 0.0  ;;  %v1149_v13 = vmax.f32 %v1084_v2, 0.0  ;;  %v1068_v4 = vadd.f32 %v1067_v60, %v891_v5  ;;  %v1088_v14 = vadd.f32 %v1087_v12, %v911_v57  ;;  %v926_v58 = vpop.permute.xlu1 %925  ;;  %v931_v48 = vpop.permute.xlu0 %930 }
 0x2ba   : > { %v1142_v8 = vmax.f32 %v1066_v9, 0.0  ;;  %v1150_v24 = vmax.f32 %v1086_v11, 0.0 }
 0x2bb   : > { %v1143_v18 = vmax.f32 %v1068_v4, 0.0  ;;  %v1151_v19 = vmax.f32 %v1088_v14, 0.0  ;;  %v1205_v20 = vsel %vm1188_vm2, %v1149_v13, -inf  ;;  %v1189_v21 = vsel %vm1188_vm2, %v1141_v56, -inf }
 0x2bc   : > { %v1206_v45 = vmax.f32 %v1148_v17, %v1205_v20  ;;  %v1190_v23 = vmax.f32 %v1140_v6, %v1189_v21 }
 0x2bd   : > { %v1071_v25 = vpop.f32.mrb[20].mxu0  ;;  %v1091_v27 = vpop.f32.mrb[4].mxu1  ;;  %v1193_v15 = vsel %vm1188_vm2, %v1143_v18, -inf  ;;  %v1209_v28 = vsel %vm1188_vm2, %v1151_v19, -inf }
 0x2be   : > { %v1072_v16 = vadd.f32 %v1071_v25, %v896_v49  ;;  %v1092_v10 = vadd.f32 %v1091_v27, %v916_v22  ;;  %v1093_v29 = vpop.f32.mrb[5].mxu1  ;;  %1207 = vmax.xlane.f32.xlu0 %v1206_v45  ;;  %v1073_v30 = vpop.f32.mrb[21].mxu0  ;;  %1191 = vmax.xlane.f32.xlu1 %v1190_v23  ;;  %v1194_v31 = vmax.f32 %v1142_v8, %v1193_v15 }
 0x2bf   : > { %v1094_v32 = vadd.f32 %v1093_v29, %v916_v22  ;;  %v1074_v26 = vadd.f32 %v1073_v30, %v896_v49  ;;  %v1075_v33 = vpop.f32.mrb[22].mxu0  ;;  %v1095_v34 = vpop.f32.mrb[6].mxu1  ;;  %v1210_v35 = vmax.f32 %v1150_v24, %v1209_v28 }
 0x2c0   : > { %v1076_v36 = vadd.f32 %v1075_v33, %v901_v55  ;;  %v1096_v37 = vadd.f32 %v1095_v34, %v921_v7  ;;  %v1077_v38 = vpop.f32.mrb[23].mxu0  ;;  %v1097_v39 = vpop.f32.mrb[7].mxu1  ;;  %v1144_v44 = vmax.f32 %v1072_v16, 0.0  ;;  %v1152_v51 = vmax.f32 %v1092_v10, 0.0 }
 0x2c1   : > { %v1153_v40 = vmax.f32 %v1094_v32, 0.0  ;;  %v1145_v41 = vmax.f32 %v1074_v26, 0.0  ;;  %v1078_v42 = vadd.f32 %v1077_v38, %v901_v55  ;;  %v1098_v43 = vadd.f32 %v1097_v39, %v921_v7  ;;  %v936_v6 = vpop.permute.xlu1 %935  ;;  %v941_v7 = vpop.permute.xlu0 %940 }
 0x2c2   : > { %1195 = vmax.xlane.f32.xlu0 %v1194_v31  ;;  %1211 = vmax.xlane.f32.xlu1 %v1210_v35  ;;  %v1146_v5 = vmax.f32 %v1076_v36, 0.0  ;;  %v1154_v54 = vmax.f32 %v1096_v37, 0.0 }
 0x2c3   : > { %v1147_v47 = vmax.f32 %v1078_v42, 0.0  ;;  %v1155_v46 = vmax.f32 %v1098_v43, 0.0  ;;  %v1197_v50 = vsel %vm1188_vm2, %v1145_v41, -inf  ;;  %v1213_v52 = vsel %vm1188_vm2, %v1153_v40, -inf }
 0x2c4   : > { %v1198_v49 = vmax.f32 %v1144_v44, %v1197_v50  ;;  %v1214_v57 = vmax.f32 %v1152_v51, %v1213_v52 }
 0x2c5   : > { %v1101_v53 = vpop.f32.mrb[8].mxu1  ;;  %v1201_v59 = vsel %vm1188_vm2, %v1147_v47, -inf  ;;  %v1217_v55 = vsel %vm1188_vm2, %v1155_v46, -inf  ;;  %v946_v29 = vpop.permute.xlu1 %945 }
 0x2c6   : > { %v1102_v61 = vadd.f32 %v1101_v53, %v926_v58  ;;  %v1103_v62 = vpop.f32.mrb[9].mxu1  ;;  %1199 = vmax.xlane.f32.xlu0 %v1198_v49  ;;  %v1202_v63 = vmax.f32 %v1146_v5, %v1201_v59  ;;  %v1218_v0 = vmax.f32 %v1154_v54, %v1217_v55  ;;  %v951_v34 = vpop.permute.xlu0 %950 }
 0x2c7   : > { %v1104_v2 = vadd.f32 %v1103_v62, %v926_v58  ;;  %v1105_v3 = vpop.f32.mrb[10].mxu1 }
 0x2c8   : > { %v1106_v1 = vadd.f32 %v1105_v3, %v931_v48  ;;  %v1107_v9 = vpop.f32.mrb[11].mxu1  ;;  %1203 = vmax.xlane.f32.xlu1 %v1202_v63  ;;  %v1156_v12 = vmax.f32 %v1102_v61, 0.0 }
 0x2c9   : > { %v1157_v11 = vmax.f32 %v1104_v2, 0.0  ;;  %v1108_v60 = vadd.f32 %v1107_v9, %v931_v48  ;;  %v956_v47 = vpop.permute.xlu1 %955  ;;  %v1176_v9 = vld [vmem:[#allocation2 + $0x20] sm:$0xff] }
 0x2ca   : > { %1215 = vmax.xlane.f32.xlu0 %v1214_v57  ;;  %v1158_v4 = vmax.f32 %v1106_v1, 0.0  ;;  %v961_v49 = vpop.permute.xlu0 %960 }
 0x2cb   : > { %v1159_v56 = vmax.f32 %v1108_v60, 0.0  ;;  %v1221_v13 = vsel %vm1188_vm2, %v1157_v11, -inf  ;;  %v1172_v11 = vld [vmem:[#allocation2] sm:$0xff] }
 0x2cc   : > { %1219 = vmax.xlane.f32.xlu1 %v1218_v0  ;;  %v1222_v14 = vmax.f32 %v1156_v12, %v1221_v13 }
 0x2cd   : > { %v1111_v17 = vpop.f32.mrb[12].mxu1  ;;  %v1225_v18 = vsel %vm1188_vm2, %v1159_v56, -inf }
 0x2ce   : > { %v1112_v19 = vadd.f32 %v1111_v17, %v936_v6  ;;  %v1113_v20 = vpop.f32.mrb[13].mxu1  ;;  %1223 = vmax.xlane.f32.xlu0 %v1222_v14  ;;  %v1226_v21 = vmax.f32 %v1158_v4, %v1225_v18  ;;  %v1173_v4 = vld [vmem:[#allocation2 + $0x8] sm:$0xff] }
 0x2cf   : > { %v1114_v22 = vadd.f32 %v1113_v20, %v936_v6  ;;  %v1115_v8 = vpop.f32.mrb[14].mxu1  ;;  %v1177_v14 = vld [vmem:[#allocation2 + $0x28] sm:$0xff]  ;;  %v1174_v20 = vld [vmem:[#allocation2 + $0x10] sm:$0xff] }
 0x2d0   : > { %v1116_v45 = vadd.f32 %v1115_v8, %v941_v7  ;;  %v1117_v23 = vpop.f32.mrb[15].mxu1  ;;  %1227 = vmax.xlane.f32.xlu1 %v1226_v21  ;;  %v1160_v27 = vmax.f32 %v1112_v19, 0.0 }
 0x2d1   : > { %v1161_v24 = vmax.f32 %v1114_v22, 0.0  ;;  %v1118_v25 = vadd.f32 %v1117_v23, %v941_v7  ;;  %v1175_v7 = vld [vmem:[#allocation2 + $0x18] sm:$0xff] }
 0x2d2   : > { %v1162_v16 = vmax.f32 %v1116_v45, 0.0 }
 0x2d3   : > { %v1163_v15 = vmax.f32 %v1118_v25, 0.0  ;;  %v1229_v28 = vsel %vm1188_vm2, %v1161_v24, -inf  ;;  %v1178_v24 = vld [vmem:[#allocation2 + $0x30] sm:$0xff] }
 0x2d4   : > { %v1230_v10 = vmax.f32 %v1160_v27, %v1229_v28 }
 0x2d5   : > { %v1121_v30 = vpop.f32.mrb[16].mxu1  ;;  %v1233_v31 = vsel %vm1188_vm2, %v1163_v15, -inf  ;;  %v1179_v15 = vld [vmem:[#allocation2 + $0x38] sm:$0xff] }
 0x2d6   : > { %v1122_v32 = vadd.f32 %v1121_v30, %v946_v29  ;;  %v1123_v26 = vpop.f32.mrb[17].mxu1  ;;  %1231 = vmax.xlane.f32.xlu0 %v1230_v10  ;;  %v1234_v33 = vmax.f32 %v1162_v16, %v1233_v31  ;;  %v1180_v30 = vld [vmem:[#allocation2 + $0x40] sm:$0xff] }
 0x2d7   : > { %v1124_v35 = vadd.f32 %v1123_v26, %v946_v29  ;;  %v1125_v36 = vpop.f32.mrb[18].mxu1  ;;  %v1181_v26 = vld [vmem:[#allocation2 + $0x48] sm:$0xff] }
 0x2d8   : > { %v1126_v37 = vadd.f32 %v1125_v36, %v951_v34  ;;  %v1127_v38 = vpop.f32.mrb[19].mxu1  ;;  %1235 = vmax.xlane.f32.xlu1 %v1234_v33  ;;  %v1164_v41 = vmax.f32 %v1122_v32, 0.0 }
 0x2d9   : > { %v1165_v39 = vmax.f32 %v1124_v35, 0.0  ;;  %v1128_v40 = vadd.f32 %v1127_v38, %v951_v34 }
 0x2da   : > { %v1166_v44 = vmax.f32 %v1126_v37, 0.0 }
 0x2db   : > { %v1167_v42 = vmax.f32 %v1128_v40, 0.0  ;;  %v1237_v43 = vsel %vm1188_vm2, %v1165_v39, -inf  ;;  %v1182_v39 = vld [vmem:[#allocation2 + $0x50] sm:$0xff] }
 0x2dc   : > { %v1238_v51 = vmax.f32 %v1164_v41, %v1237_v43 }
 0x2dd   : > { %v1131_v46 = vpop.f32.mrb[20].mxu1  ;;  %v1241_v50 = vsel %vm1188_vm2, %v1167_v42, -inf  ;;  %v1183_v42 = vld [vmem:[#allocation2 + $0x58] sm:$0xff] }
 0x2de   : > { %v1132_v52 = vadd.f32 %v1131_v46, %v956_v47  ;;  %v1133_v5 = vpop.f32.mrb[21].mxu1  ;;  %1239 = vmax.xlane.f32.xlu0 %v1238_v51  ;;  %v1242_v54 = vmax.f32 %v1166_v44, %v1241_v50  ;;  %v1184_v50 = vld [vmem:[#allocation2 + $0x60] sm:$0xff] }
 0x2df   : > { %v1134_v57 = vadd.f32 %v1133_v5, %v956_v47  ;;  %v1135_v58 = vpop.f32.mrb[22].mxu1  ;;  %v1185_v5 = vld [vmem:[#allocation2 + $0x68] sm:$0xff] }
 0x2e0   : > { %v1136_v53 = vadd.f32 %v1135_v58, %v961_v49  ;;  %v1137_v59 = vpop.f32.mrb[23].mxu1  ;;  %1243 = vmax.xlane.f32.xlu1 %v1242_v54  ;;  %v1168_v62 = vmax.f32 %v1132_v52, 0.0 }
 0x2e1   : > { %v1169_v55 = vmax.f32 %v1134_v57, 0.0  ;;  %v1138_v61 = vadd.f32 %v1137_v59, %v961_v49  ;;  %v1186_v59 = vld [vmem:[#allocation2 + $0x70] sm:$0xff] }
 0x2e2   : > { %v1170_v48 = vmax.f32 %v1136_v53, 0.0 }
 0x2e3   : > { %v1171_v63 = vmax.f32 %v1138_v61, 0.0  ;;  %v1245_v0 = vsel %vm1188_vm2, %v1169_v55, -inf  ;;  %v1187_v61 = vld [vmem:[#allocation2 + $0x78] sm:$0xff] }
 0x2e4   : > { %v1246_v2 = vmax.f32 %v1168_v62, %v1245_v0 }
 0x2e5   : > { %v1249_v3 = vsel %vm1188_vm2, %v1171_v63, -inf }
 0x2e6   : > { %1247 = vmax.xlane.f32.xlu0 %v1246_v2  ;;  %v1250_v1 = vmax.f32 %v1170_v48, %v1249_v3 }
 0x2e8   : > { %1251 = vmax.xlane.f32.xlu1 %v1250_v1 }
 0x34b   : > { %v1208_v60 = vpop.xlane.xlu0 %1207  ;;  %v1192_v12 = vpop.xlane.xlu1 %1191 }
 0x34c   : > { %v1257_v56 = vmax.f32 %v1176_v9, %v1208_v60  ;;  %v1253_v13 = vmax.f32 %v1172_v11, %v1192_v12 }
 0x34e   : > { %1274 = vst.msk [vmem:[#allocation2 + $0x20] sm:$0xff] %vm312_vm1, %v1257_v56  ;;  %1270 = vst.msk [vmem:[#allocation2] sm:$0xff] %vm312_vm1, %v1253_v13 }
 0x34f   : > { %v1196_v6 = vpop.xlane.xlu0 %1195  ;;  %v1212_v17 = vpop.xlane.xlu1 %1211 }
 0x350   : > { %v1254_v18 = vmax.f32 %v1173_v4, %v1196_v6  ;;  %v1258_v19 = vmax.f32 %v1177_v14, %v1212_v17 }
 0x352   : > { %1271 = vst.msk [vmem:[#allocation2 + $0x8] sm:$0xff] %vm312_vm1, %v1254_v18  ;;  %1275 = vst.msk [vmem:[#allocation2 + $0x28] sm:$0xff] %vm312_vm1, %v1258_v19 }
 0x353   : > { %v1200_v21 = vpop.xlane.xlu0 %1199 }
 0x354   : > { %v1255_v22 = vmax.f32 %v1174_v20, %v1200_v21 }
 0x355   : > { %v1293_v8 = vld [vmem:[#allocation2 + $0x20] sm:$0xff]  ;;  %v1204_v23 = vpop.xlane.xlu1 %1203 }
 0x356   : > { %v1289_v45 = vld [vmem:[#allocation2] sm:$0xff]  ;;  %1309 = vst.msk [vmem:[%s1901_s21 + $0x20] sm:$0xff] %vm312_vm1, %v1293_v8  ;;  %1272 = vst.msk [vmem:[#allocation2 + $0x10] sm:$0xff] %vm312_vm1, %v1255_v22  ;;  %v1256_v25 = vmax.f32 %v1175_v7, %v1204_v23 }
 0x357   : > { %1305 = vst.msk [vmem:[%s1901_s21] sm:$0xff] %vm312_vm1, %v1289_v45  ;;  %v1216_v27 = vpop.xlane.xlu0 %1215 }
 0x358   : > { %1273 = vst.msk [vmem:[#allocation2 + $0x18] sm:$0xff] %vm312_vm1, %v1256_v25  ;;  %v1259_v28 = vmax.f32 %v1178_v24, %v1216_v27 }
 0x359   : > { %v1290_v16 = vld [vmem:[#allocation2 + $0x8] sm:$0xff]  ;;  %v1220_v29 = vpop.xlane.xlu1 %1219 }
 0x35a   : > { %v1294_v10 = vld [vmem:[#allocation2 + $0x28] sm:$0xff]  ;;  %1306 = vst.msk [vmem:[%s1901_s21 + $0x8] sm:$0xff] %vm312_vm1, %v1290_v16  ;;  %1276 = vst.msk [vmem:[#allocation2 + $0x30] sm:$0xff] %vm312_vm1, %v1259_v28  ;;  %v1260_v31 = vmax.f32 %v1179_v15, %v1220_v29 }
 0x35b   : > { %1310 = vst.msk [vmem:[%s1901_s21 + $0x28] sm:$0xff] %vm312_vm1, %v1294_v10  ;;  %v1224_v32 = vpop.xlane.xlu0 %1223 }
 0x35c   : > { %1277 = vst.msk [vmem:[#allocation2 + $0x38] sm:$0xff] %vm312_vm1, %v1260_v31  ;;  %v1261_v33 = vmax.f32 %v1180_v30, %v1224_v32 }
 0x35d   : > { %v1291_v34 = vld [vmem:[#allocation2 + $0x10] sm:$0xff]  ;;  %v1228_v35 = vpop.xlane.xlu1 %1227 }
 0x35e   : > { %1307 = vst.msk [vmem:[%s1901_s21 + $0x10] sm:$0xff] %vm312_vm1, %v1291_v34  ;;  %1278 = vst.msk [vmem:[#allocation2 + $0x40] sm:$0xff] %vm312_vm1, %v1261_v33  ;;  %v1262_v36 = vmax.f32 %v1181_v26, %v1228_v35 }
 0x35f   : > { %v1292_v37 = vld [vmem:[#allocation2 + $0x18] sm:$0xff] }
 0x360   : > { %1308 = vst.msk [vmem:[%s1901_s21 + $0x18] sm:$0xff] %vm312_vm1, %v1292_v37  ;;  %1279 = vst.msk [vmem:[#allocation2 + $0x48] sm:$0xff] %vm312_vm1, %v1262_v36 }
 0x361   : > { %v1295_v38 = vld [vmem:[#allocation2 + $0x30] sm:$0xff] }
 0x362   : > { %1311 = vst.msk [vmem:[%s1901_s21 + $0x30] sm:$0xff] %vm312_vm1, %v1295_v38 }
 0x363   : > { %v1296_v40 = vld [vmem:[#allocation2 + $0x38] sm:$0xff]  ;;  %v1232_v41 = vpop.xlane.xlu0 %1231 }
 0x364   : > { %1312 = vst.msk [vmem:[%s1901_s21 + $0x38] sm:$0xff] %vm312_vm1, %v1296_v40  ;;  %v1263_v43 = vmax.f32 %v1182_v39, %v1232_v41 }
 0x365   : > { %v1297_v44 = vld [vmem:[#allocation2 + $0x40] sm:$0xff]  ;;  %v1236_v51 = vpop.xlane.xlu1 %1235 }
 0x366   : > { %1313 = vst.msk [vmem:[%s1901_s21 + $0x40] sm:$0xff] %vm312_vm1, %v1297_v44  ;;  %1280 = vst.msk [vmem:[#allocation2 + $0x50] sm:$0xff] %vm312_vm1, %v1263_v43  ;;  %v1264_v47 = vmax.f32 %v1183_v42, %v1236_v51 }
 0x367   : > { %v1298_v46 = vld [vmem:[#allocation2 + $0x48] sm:$0xff] }
 0x368   : > { %1314 = vst.msk [vmem:[%s1901_s21 + $0x48] sm:$0xff] %vm312_vm1, %v1298_v46  ;;  %1281 = vst.msk [vmem:[#allocation2 + $0x58] sm:$0xff] %vm312_vm1, %v1264_v47 }
 0x36b   : > { %v1240_v52 = vpop.xlane.xlu0 %1239 }
 0x36c   : > { %v1265_v54 = vmax.f32 %v1184_v50, %v1240_v52 }
 0x36d   : > { %v1299_v49 = vld [vmem:[#allocation2 + $0x50] sm:$0xff]  ;;  %v1244_v57 = vpop.xlane.xlu1 %1243 }
 0x36e   : > { %1315 = vst.msk [vmem:[%s1901_s21 + $0x50] sm:$0xff] %vm312_vm1, %v1299_v49  ;;  %1282 = vst.msk [vmem:[#allocation2 + $0x60] sm:$0xff] %vm312_vm1, %v1265_v54  ;;  %v1266_v58 = vmax.f32 %v1185_v5, %v1244_v57 }
 0x36f   : > { %v1300_v53 = vld [vmem:[#allocation2 + $0x58] sm:$0xff] }
 0x370   : > { %1316 = vst.msk [vmem:[%s1901_s21 + $0x58] sm:$0xff] %vm312_vm1, %v1300_v53  ;;  %1283 = vst.msk [vmem:[#allocation2 + $0x68] sm:$0xff] %vm312_vm1, %v1266_v58 }
 0x373   : > { %v1248_v55 = vpop.xlane.xlu0 %1247 }
 0x374   : > { %v1267_v62 = vmax.f32 %v1186_v59, %v1248_v55 }
 0x375   : > { %v1301_v63 = vld [vmem:[#allocation2 + $0x60] sm:$0xff]  ;;  %v1252_v0 = vpop.xlane.xlu1 %1251 }
 0x376   : > { %1317 = vst.msk [vmem:[%s1901_s21 + $0x60] sm:$0xff] %vm312_vm1, %v1301_v63  ;;  %1284 = vst.msk [vmem:[#allocation2 + $0x70] sm:$0xff] %vm312_vm1, %v1267_v62  ;;  %v1268_v48 = vmax.f32 %v1187_v61, %v1252_v0 }
 0x377   : > { %v1302_v2 = vld [vmem:[#allocation2 + $0x68] sm:$0xff] }
 0x378   : > { %1318 = vst.msk [vmem:[%s1901_s21 + $0x68] sm:$0xff] %vm312_vm1, %v1302_v2  ;;  %1285 = vst.msk [vmem:[#allocation2 + $0x78] sm:$0xff] %vm312_vm1, %v1268_v48 }
 0x37d   : > { %v1303_v3 = vld [vmem:[#allocation2 + $0x70] sm:$0xff] }
 0x37e   : > { %1319 = vst.msk [vmem:[%s1901_s21 + $0x70] sm:$0xff] %vm312_vm1, %v1303_v3 }
 0x37f   : > { %v1304_v1 = vld [vmem:[#allocation2 + $0x78] sm:$0xff] }
 0x380   : > { %1320 = vst.msk [vmem:[%s1901_s21 + $0x78] sm:$0xff] %vm312_vm1, %v1304_v1 }
 0x381 PF: > { %s17_s26 = sadd.s32 1, %s1512_s26   ;;  %s1964_s24 = smov %s1508_s25 }
 0x382   : > { %p14_p5 = scmp.ge.s32.totalorder %s17_s26, 4   ;;  %s1965_s25 = smov %s1967_s27 }
 0x384   :  { %16 = sbr.rel (!%p14_p5) target bundleno = 2 (0x2), region = 86 }

</bundles_post_ra>
